<compile_context>
chip_gen: v6e
topology: v6e:2x2x1
jax: 0.10.0
libtpu: 0.0.40
codegen_flags: <defaults>
</compile_context>

<pallas_src>
import functools

import jax
import jax.numpy as jnp
from jax.experimental import pallas as pl
from jax.experimental.pallas import tpu as pltpu

K_PAD = 896          # 784 padded up to 7*128
C_PAD = 128          # 10 classes padded to one full lane register
NEG_BIG = -1e30      # fills padded class columns so softmax ignores them


def _mlp_kernel(x_ref, w1_ref, b1_ref, w2_ref, b2_ref, w3_ref, b3_ref,
                w4_ref, b4_ref, o_ref):
    # Layer 1: (TB, 896) bf16 @ (896, 256) bf16 -> f32 accum; bias+ReLU in f32
    h = jnp.dot(x_ref[...], w1_ref[...], preferred_element_type=jnp.float32)
    h = jnp.maximum(h + b1_ref[...], 0.0)
    # Layer 2: (TB, 256) @ (256, 128)
    h = jnp.dot(h.astype(jnp.bfloat16), w2_ref[...],
                preferred_element_type=jnp.float32)
    h = jnp.maximum(h + b2_ref[...], 0.0)
    # Layer 3: (TB, 128) @ (128, 64)
    h = jnp.dot(h.astype(jnp.bfloat16), w3_ref[...],
                preferred_element_type=jnp.float32)
    h = jnp.maximum(h + b3_ref[...], 0.0)
    # Layer 4: (TB, 64) @ (64, 128) + log_softmax.  Padded class columns carry
    # bias = -1e30 -> exp(...) == 0, so the reduction over 128 lanes equals the
    # reduction over the 10 real classes; padded columns are sliced off outside.
    logits = jnp.dot(h.astype(jnp.bfloat16), w4_ref[...],
                     preferred_element_type=jnp.float32) + b4_ref[...]
    m = jnp.max(logits, axis=-1, keepdims=True)
    shifted = logits - m
    lse = jnp.log(jnp.sum(jnp.exp(shifted), axis=-1, keepdims=True))
    o_ref[...] = (shifted - lse).astype(o_ref.dtype)


def _round_up(n, m):
    return (n + m - 1) // m * m


@functools.partial(jax.jit, static_argnames=("tb",))
def mlp_forward(x, params, *, tb=256):
    """x: (B, 1, 28, 28) or (B, 784). Returns log-probs of shape (B, 10)."""
    B = x.shape[0]
    x = x.reshape(B, -1).astype(jnp.float32)   # x.view(x.shape[0], -1)
    assert x.shape[1] == 784
    w1, b1, w2, b2, w3, b3, w4, b4 = params

    # --- parameter prep: zero-pad K (784->896) and classes (10->128);
    #     matmul operands in bf16, biases stay f32.
    w1p = jnp.pad(w1, ((0, K_PAD - 784), (0, 0))).astype(jnp.bfloat16)
    w2p = w2.astype(jnp.bfloat16)
    w3p = w3.astype(jnp.bfloat16)
    w4p = jnp.pad(w4, ((0, 0), (0, C_PAD - 10))).astype(jnp.bfloat16)
    b1p = b1.astype(jnp.float32)
    b2p = b2.astype(jnp.float32)
    b3p = b3.astype(jnp.float32)
    b4p = jnp.pad(b4.astype(jnp.float32), ((0, 0), (0, C_PAD - 10)),
                  constant_values=NEG_BIG)

    # --- batch tiling: big MXU-friendly tile, shrunk for tiny batches; pad the
    #     batch to a tile multiple so no undefined rows are ever computed.
    tb_eff = min(tb, _round_up(B, 8))
    B_pad = _round_up(B, tb_eff)
    xp = jnp.pad(x, ((0, B_pad - B), (0, K_PAD - 784))).astype(jnp.bfloat16)

    grid = (B_pad // tb_eff,)
    # Weights/biases are small and grid-invariant: whole-array blocks at (0,0).
    full = lambda arr: pl.BlockSpec(arr.shape, lambda i: (0, 0))
    out = pl.pallas_call(
        _mlp_kernel,
        out_shape=jax.ShapeDtypeStruct((B_pad, C_PAD), jnp.float32),
        grid_spec=pltpu.PrefetchScalarGridSpec(
            num_scalar_prefetch=0,
            grid=grid,
            in_specs=[
                pl.BlockSpec((tb_eff, K_PAD), lambda i: (i, 0)),
                full(w1p), full(b1p),
                full(w2p), full(b2p),
                full(w3p), full(b3p),
                full(w4p), full(b4p),
            ],
            out_specs=pl.BlockSpec((tb_eff, C_PAD), lambda i: (i, 0)),
        ),
        compiler_params=pltpu.CompilerParams(
            dimension_semantics=("parallel",)),
    )(xp, w1p, b1p, w2p, b2p, w3p, b3p, w4p, b4p)
    return out[:B, :10]


def init_params(key):
    """Deterministic init mimicking nn.Linear's uniform(-1/sqrt(in), 1/sqrt(in))."""
    dims = [(784, 256), (256, 128), (128, 64), (64, 10)]
    params = []
    for (fan_in, fan_out) in dims:
        key, kw, kb = jax.random.split(key, 3)
        bound = 1.0 / (fan_in ** 0.5)
        w = jax.random.uniform(kw, (fan_in, fan_out), jnp.float32,
                               minval=-bound, maxval=bound)
        b = jax.random.uniform(kb, (1, fan_out), jnp.float32,
                               minval=-bound, maxval=bound)
        params += [w, b]
    return tuple(params)


def reference_forward(x, params):
    """Pure-JAX reference with matching numerics (bf16 operands, f32 accum)."""
    B = x.shape[0]
    h = x.reshape(B, -1).astype(jnp.float32)
    w1, b1, w2, b2, w3, b3, w4, b4 = params

    def dense(h, w, b):
        return jnp.dot(h.astype(jnp.bfloat16), w.astype(jnp.bfloat16),
                       preferred_element_type=jnp.float32) + b

    h = jnp.maximum(dense(h, w1, b1), 0.0)
    h = jnp.maximum(dense(h, w2, b2), 0.0)
    h = jnp.maximum(dense(h, w3, b3), 0.0)
    logits = dense(h, w4, b4)
    return jax.nn.log_softmax(logits, axis=1)


if __name__ == "__main__":
    key = jax.random.PRNGKey(0)
    kx, kp = jax.random.split(key)
    # MNIST-like input: batch=8, 1x28x28 images (flattened to 784 in forward)
    x = jax.random.normal(kx, (8, 1, 28, 28), jnp.float32)
    params = init_params(kp)

    out = mlp_forward(x, params)
    out = jax.block_until_ready(out)

    ref = reference_forward(x, params)
    assert out.shape == (8, 10)
    assert jnp.allclose(out, ref, atol=1e-2, rtol=1e-2), "mismatch vs reference"
    # log-softmax rows should sum (in prob space) to ~1
    assert jnp.allclose(jnp.sum(jnp.exp(out), axis=1), 1.0, atol=1e-3)

    print("KERNEL_OK")
</pallas_src>

<mosaic_0001>
module attributes {stable_mosaic.version = 11 : i64} {
  func.func @_mlp_kernel(%arg0: i32, %arg1: memref<8x896xbf16, #tpu.memory_space<vmem>>, %arg2: memref<896x256xbf16, #tpu.memory_space<vmem>>, %arg3: memref<1x256xf32, #tpu.memory_space<vmem>>, %arg4: memref<256x128xbf16, #tpu.memory_space<vmem>>, %arg5: memref<1x128xf32, #tpu.memory_space<vmem>>, %arg6: memref<128x64xbf16, #tpu.memory_space<vmem>>, %arg7: memref<1x64xf32, #tpu.memory_space<vmem>>, %arg8: memref<64x128xbf16, #tpu.memory_space<vmem>>, %arg9: memref<1x128xf32, #tpu.memory_space<vmem>>, %arg10: memref<8x128xf32, #tpu.memory_space<vmem>>) attributes {dimension_semantics = [#tpu.dimension_semantics<parallel>], iteration_bounds = array<i64: 1>, scalar_prefetch = 0 : i64, scratch_operands = 0 : i64, tpu.core_type = #tpu.core_type<tc>, window_params = [{transform_indices = @transform_0, window_bounds = array<i64: 8, 896>}, {pipeline_mode = #tpu.pipeline_mode<synchronous>, transform_indices = @transform_1, window_bounds = array<i64: 896, 256>}, {pipeline_mode = #tpu.pipeline_mode<synchronous>, transform_indices = @transform_2, window_bounds = array<i64: 1, 256>}, {pipeline_mode = #tpu.pipeline_mode<synchronous>, transform_indices = @transform_3, window_bounds = array<i64: 256, 128>}, {pipeline_mode = #tpu.pipeline_mode<synchronous>, transform_indices = @transform_4, window_bounds = array<i64: 1, 128>}, {pipeline_mode = #tpu.pipeline_mode<synchronous>, transform_indices = @transform_5, window_bounds = array<i64: 128, 64>}, {pipeline_mode = #tpu.pipeline_mode<synchronous>, transform_indices = @transform_6, window_bounds = array<i64: 1, 64>}, {pipeline_mode = #tpu.pipeline_mode<synchronous>, transform_indices = @transform_7, window_bounds = array<i64: 64, 128>}, {pipeline_mode = #tpu.pipeline_mode<synchronous>, transform_indices = @transform_8, window_bounds = array<i64: 1, 128>}, {transform_indices = @transform_9, window_bounds = array<i64: 8, 128>}]} {
    %c0 = arith.constant 0 : index
    %c0_0 = arith.constant 0 : index
    %0 = vector.load %arg1[%c0, %c0_0] : memref<8x896xbf16, #tpu.memory_space<vmem>>, vector<8x896xbf16>
    %c0_1 = arith.constant 0 : index
    %c0_2 = arith.constant 0 : index
    %1 = vector.load %arg2[%c0_1, %c0_2] : memref<896x256xbf16, #tpu.memory_space<vmem>>, vector<896x256xbf16>
    %cst = arith.constant dense<0.000000e+00> : vector<8x256xf32>
    %2 = tpu.matmul %0, %1, %cst {dimension_numbers = #tpu.dot_dimension_numbers<[1], [0], [0], [1], [0, 0, 1, 1], [], []>} : vector<8x896xbf16>, vector<896x256xbf16>, vector<8x256xf32> -> vector<8x256xf32>
    %c0_3 = arith.constant 0 : index
    %c0_4 = arith.constant 0 : index
    %3 = vector.load %arg3[%c0_3, %c0_4] : memref<1x256xf32, #tpu.memory_space<vmem>>, vector<1x256xf32>
    %4 = vector.broadcast %3 : vector<1x256xf32> to vector<8x256xf32>
    %5 = arith.addf %2, %4 : vector<8x256xf32>
    %cst_5 = arith.constant 0.000000e+00 : f32
    %6 = vector.broadcast %cst_5 : f32 to vector<8x256xf32>
    %7 = arith.maximumf %5, %6 : vector<8x256xf32>
    %8 = arith.truncf %7 : vector<8x256xf32> to vector<8x256xbf16>
    %c0_6 = arith.constant 0 : index
    %c0_7 = arith.constant 0 : index
    %9 = vector.load %arg4[%c0_6, %c0_7] : memref<256x128xbf16, #tpu.memory_space<vmem>>, vector<256x128xbf16>
    %cst_8 = arith.constant dense<0.000000e+00> : vector<8x128xf32>
    %10 = tpu.matmul %8, %9, %cst_8 {dimension_numbers = #tpu.dot_dimension_numbers<[1], [0], [0], [1], [0, 0, 1, 1], [], []>} : vector<8x256xbf16>, vector<256x128xbf16>, vector<8x128xf32> -> vector<8x128xf32>
    %c0_9 = arith.constant 0 : index
    %c0_10 = arith.constant 0 : index
    %11 = vector.load %arg5[%c0_9, %c0_10] : memref<1x128xf32, #tpu.memory_space<vmem>>, vector<1x128xf32>
    %12 = vector.broadcast %11 : vector<1x128xf32> to vector<8x128xf32>
    %13 = arith.addf %10, %12 : vector<8x128xf32>
    %cst_11 = arith.constant 0.000000e+00 : f32
    %14 = vector.broadcast %cst_11 : f32 to vector<8x128xf32>
    %15 = arith.maximumf %13, %14 : vector<8x128xf32>
    %16 = arith.truncf %15 : vector<8x128xf32> to vector<8x128xbf16>
    %c0_12 = arith.constant 0 : index
    %c0_13 = arith.constant 0 : index
    %17 = vector.load %arg6[%c0_12, %c0_13] : memref<128x64xbf16, #tpu.memory_space<vmem>>, vector<128x64xbf16>
    %cst_14 = arith.constant dense<0.000000e+00> : vector<8x64xf32>
    %18 = tpu.matmul %16, %17, %cst_14 {dimension_numbers = #tpu.dot_dimension_numbers<[1], [0], [0], [1], [0, 0, 1, 1], [], []>} : vector<8x128xbf16>, vector<128x64xbf16>, vector<8x64xf32> -> vector<8x64xf32>
    %c0_15 = arith.constant 0 : index
    %c0_16 = arith.constant 0 : index
    %19 = vector.load %arg7[%c0_15, %c0_16] : memref<1x64xf32, #tpu.memory_space<vmem>>, vector<1x64xf32>
    %20 = vector.broadcast %19 : vector<1x64xf32> to vector<8x64xf32>
    %21 = arith.addf %18, %20 : vector<8x64xf32>
    %cst_17 = arith.constant 0.000000e+00 : f32
    %22 = vector.broadcast %cst_17 : f32 to vector<8x64xf32>
    %23 = arith.maximumf %21, %22 : vector<8x64xf32>
    %24 = arith.truncf %23 : vector<8x64xf32> to vector<8x64xbf16>
    %c0_18 = arith.constant 0 : index
    %c0_19 = arith.constant 0 : index
    %25 = vector.load %arg8[%c0_18, %c0_19] : memref<64x128xbf16, #tpu.memory_space<vmem>>, vector<64x128xbf16>
    %cst_20 = arith.constant dense<0.000000e+00> : vector<8x128xf32>
    %26 = tpu.matmul %24, %25, %cst_20 {dimension_numbers = #tpu.dot_dimension_numbers<[1], [0], [0], [1], [0, 0, 1, 1], [], []>} : vector<8x64xbf16>, vector<64x128xbf16>, vector<8x128xf32> -> vector<8x128xf32>
    %c0_21 = arith.constant 0 : index
    %c0_22 = arith.constant 0 : index
    %27 = vector.load %arg9[%c0_21, %c0_22] : memref<1x128xf32, #tpu.memory_space<vmem>>, vector<1x128xf32>
    %28 = vector.broadcast %27 : vector<1x128xf32> to vector<8x128xf32>
    %29 = arith.addf %26, %28 : vector<8x128xf32>
    %cst_23 = arith.constant dense<0xFF800000> : vector<8xf32>
    %30 = vector.multi_reduction <maximumf>, %29, %cst_23 [1] : vector<8x128xf32> to vector<8xf32>
    %31 = vector.shape_cast %30 : vector<8xf32> to vector<8x1xf32>
    %32 = vector.broadcast %31 : vector<8x1xf32> to vector<8x128xf32>
    %33 = arith.subf %29, %32 : vector<8x128xf32>
    %34 = math.exp %33 : vector<8x128xf32>
    %cst_24 = arith.constant dense<0.000000e+00> : vector<8xf32>
    %35 = vector.multi_reduction <add>, %34, %cst_24 [1] : vector<8x128xf32> to vector<8xf32>
    %36 = vector.shape_cast %35 : vector<8xf32> to vector<8x1xf32>
    %37 = math.log %36 : vector<8x1xf32>
    %38 = vector.broadcast %37 : vector<8x1xf32> to vector<8x128xf32>
    %39 = arith.subf %33, %38 : vector<8x128xf32>
    %c0_25 = arith.constant 0 : index
    %c0_26 = arith.constant 0 : index
    %40 = vector.load %arg10[%c0_25, %c0_26] : memref<8x128xf32, #tpu.memory_space<vmem>>, vector<8x128xf32>
    tpu.vector_store %arg10[%c0_25, %c0_26], %39 {strides = array<i32>} : memref<8x128xf32, #tpu.memory_space<vmem>>, vector<8x128xf32>,
    return
  }
  func.func @transform_0(%arg0: i32) -> (i32, i32) {
    %c0_i32 = arith.constant 0 : i32
    %c0_i32_0 = arith.constant 0 : i32
    return %arg0, %c0_i32 : i32, i32
  }
  func.func @transform_1(%arg0: i32) -> (i32, i32) {
    %c0_i32 = arith.constant 0 : i32
    %c0_i32_0 = arith.constant 0 : i32
    %c0_i32_1 = arith.constant 0 : i32
    return %c0_i32, %c0_i32_0 : i32, i32
  }
  func.func @transform_2(%arg0: i32) -> (i32, i32) {
    %c0_i32 = arith.constant 0 : i32
    %c0_i32_0 = arith.constant 0 : i32
    %c0_i32_1 = arith.constant 0 : i32
    return %c0_i32, %c0_i32_0 : i32, i32
  }
  func.func @transform_3(%arg0: i32) -> (i32, i32) {
    %c0_i32 = arith.constant 0 : i32
    %c0_i32_0 = arith.constant 0 : i32
    %c0_i32_1 = arith.constant 0 : i32
    return %c0_i32, %c0_i32_0 : i32, i32
  }
  func.func @transform_4(%arg0: i32) -> (i32, i32) {
    %c0_i32 = arith.constant 0 : i32
    %c0_i32_0 = arith.constant 0 : i32
    %c0_i32_1 = arith.constant 0 : i32
    return %c0_i32, %c0_i32_0 : i32, i32
  }
  func.func @transform_5(%arg0: i32) -> (i32, i32) {
    %c0_i32 = arith.constant 0 : i32
    %c0_i32_0 = arith.constant 0 : i32
    %c0_i32_1 = arith.constant 0 : i32
    return %c0_i32, %c0_i32_0 : i32, i32
  }
  func.func @transform_6(%arg0: i32) -> (i32, i32) {
    %c0_i32 = arith.constant 0 : i32
    %c0_i32_0 = arith.constant 0 : i32
    %c0_i32_1 = arith.constant 0 : i32
    return %c0_i32, %c0_i32_0 : i32, i32
  }
  func.func @transform_7(%arg0: i32) -> (i32, i32) {
    %c0_i32 = arith.constant 0 : i32
    %c0_i32_0 = arith.constant 0 : i32
    %c0_i32_1 = arith.constant 0 : i32
    return %c0_i32, %c0_i32_0 : i32, i32
  }
  func.func @transform_8(%arg0: i32) -> (i32, i32) {
    %c0_i32 = arith.constant 0 : i32
    %c0_i32_0 = arith.constant 0 : i32
    %c0_i32_1 = arith.constant 0 : i32
    return %c0_i32, %c0_i32_0 : i32, i32
  }
  func.func @transform_9(%arg0: i32) -> (i32, i32) {
    %c0_i32 = arith.constant 0 : i32
    %c0_i32_0 = arith.constant 0 : i32
    return %arg0, %c0_i32 : i32, i32
  }
}

</mosaic_0001>

<bundles_post_ra>
// kernel: mlp_forward.1
= control target key start
LH: loop header
LB: loop body
LE: loop exit
PB: predicated region body
PF: predicated region fallthrough
CT: control target
= control target key end

     0   :  { %s2286_s0 = inlined_call_operand.vmem [shape: bf16[8,896], index: 0, kind: input, shape index: {}]   ;;  %s2287_s1 = inlined_call_operand.vmem [shape: bf16[896,256], index: 1, kind: input, shape index: {}]   ;;  %s2288_s2 = inlined_call_operand.vmem [shape: f32[1,256], index: 2, kind: input, shape index: {}]   ;;  %s2289_s3 = inlined_call_operand.vmem [shape: bf16[256,128], index: 3, kind: input, shape index: {}]   ;;  %s2290_s4 = inlined_call_operand.vmem [shape: f32[1,128], index: 4, kind: input, shape index: {}]   ;;  %s2291_s5 = inlined_call_operand.vmem [shape: bf16[128,64], index: 5, kind: input, shape index: {}]   ;;  %s2292_s6 = inlined_call_operand.vmem [shape: f32[1,64], index: 6, kind: input, shape index: {}]   ;;  %s2293_s7 = inlined_call_operand.vmem [shape: bf16[64,128], index: 7, kind: input, shape index: {}]   ;;  %s2294_s8 = inlined_call_operand.vmem [shape: f32[1,128], index: 8, kind: input, shape index: {}]   ;;  %s2295_s9 = inlined_call_operand.hbm [shape: f32[8,128], index: 9, kind: output, shape index: {}]  }
   0x1   :  { %v1536_v0 = vld [vmem:[%s2287_s1 + $0x74] ss:$8 sps:$4 sm:$0xff]   ;;  %v1538_v1 = vld [vmem:[%s2287_s1 + $0x70] ss:$8 sps:$4 sm:$0xff]   ;;  %v1542_v4 = vld [vmem:[%s2287_s1 + $0x64] ss:$8 sps:$4 sm:$0xff]  }
   0x2   :  { %747 = vmatprep.subr.bf16.mxu0 %v1536_v0  ;;  %v1539_v2 = vld [vmem:[%s2287_s1 + $0x174] ss:$8 sps:$4 sm:$0xff]   ;;  %v1541_v3 = vld [vmem:[%s2287_s1 + $0x170] ss:$8 sps:$4 sm:$0xff]   ;;  %v1544_v5 = vld [vmem:[%s2287_s1 + $0x60] ss:$8 sps:$4 sm:$0xff]  }
   0x3   :  { %748 = vmatpush1.bf16.msra.mxu0 %v1538_v1  ;;  %788 = vmatprep.subr.bf16.mxu1 %v1539_v2  ;;  %v1545_v6 = vld [vmem:[%s2287_s1 + $0x164] ss:$8 sps:$4 sm:$0xff]   ;;  %v1547_v7 = vld [vmem:[%s2287_s1 + $0x160] ss:$8 sps:$4 sm:$0xff]   ;;  %v1548_v8 = vld [vmem:[%s2287_s1 + $0x54] ss:$8 sps:$4 sm:$0xff]  }
   0x4   :  { %789 = vmatpush1.bf16.msra.mxu1 %v1541_v3  ;;  %749 = vmatprep.subr.bf16.mxu0 %v1542_v4  ;;  %v1550_v9 = vld [vmem:[%s2287_s1 + $0x50] ss:$8 sps:$4 sm:$0xff]   ;;  %v1551_v10 = vld [vmem:[%s2287_s1 + $0x154] ss:$8 sps:$4 sm:$0xff]   ;;  %v1554_v11 = vld [vmem:[%s2287_s1 + $0x44] ss:$8 sps:$4 sm:$0xff]  }
   0x5   :  { %790 = vmatprep.subr.bf16.mxu1 %v1545_v6  ;;  %v1553_v12 = vld [vmem:[%s2287_s1 + $0x150] ss:$8 sps:$4 sm:$0xff]   ;;  %v1557_v13 = vld [vmem:[%s2287_s1 + $0x144] ss:$8 sps:$4 sm:$0xff]   ;;  %v1556_v14 = vld [vmem:[%s2287_s1 + $0x40] ss:$8 sps:$4 sm:$0xff]  }
   0x6   :  { %v1560_v15 = vld [vmem:[%s2287_s1 + $0x34] ss:$8 sps:$4 sm:$0xff]   ;;  %v1559_v16 = vld [vmem:[%s2287_s1 + $0x140] ss:$8 sps:$4 sm:$0xff]   ;;  %v1562_v18 = vld [vmem:[%s2287_s1 + $0x30] ss:$8 sps:$4 sm:$0xff]  }
   0x7   :  { %750 = vmatpush1.bf16.msra.mxu0 %v1544_v5  ;;  %v1563_v17 = vld [vmem:[%s2287_s1 + $0x134] ss:$8 sps:$4 sm:$0xff]   ;;  %v1566_v19 = vld [vmem:[%s2287_s1 + $0x24] ss:$8 sps:$4 sm:$0xff]   ;;  %v1565_v20 = vld [vmem:[%s2287_s1 + $0x130] ss:$8 sps:$4 sm:$0xff]  }
   0x8   :  { %751 = vmatprep.subr.bf16.mxu0 %v1548_v8  ;;  %791 = vmatpush1.bf16.msra.mxu1 %v1547_v7  ;;  %v1569_v21 = vld [vmem:[%s2287_s1 + $0x124] ss:$8 sps:$4 sm:$0xff]   ;;  %v1568_v22 = vld [vmem:[%s2287_s1 + $0x20] ss:$8 sps:$4 sm:$0xff]   ;;  %v1572_v23 = vld [vmem:[%s2287_s1 + $0x14] ss:$8 sps:$4 sm:$0xff]  }
   0x9   :  { %792 = vmatprep.subr.bf16.mxu1 %v1551_v10  ;;  %v1571_v24 = vld [vmem:[%s2287_s1 + $0x120] ss:$8 sps:$4 sm:$0xff]   ;;  %v1575_v25 = vld [vmem:[%s2287_s1 + $0x114] ss:$8 sps:$4 sm:$0xff]   ;;  %v1574_v26 = vld [vmem:[%s2287_s1 + $0x10] ss:$8 sps:$4 sm:$0xff]  }
   0xa   :  { %v1578_v27 = vld [vmem:[%s2287_s1 + $0x4] ss:$8 sps:$4 sm:$0xff]   ;;  %v1577_v28 = vld [vmem:[%s2287_s1 + $0x110] ss:$8 sps:$4 sm:$0xff]   ;;  %v1580_v30 = vld [vmem:[%s2287_s1] ss:$8 sps:$4 sm:$0xff]  }
   0xb   :  { %752 = vmatpush1.bf16.msra.mxu0 %v1550_v9  ;;  %v1581_v29 = vld [vmem:[%s2287_s1 + $0x104] ss:$8 sps:$4 sm:$0xff]   ;;  %v1584_v31 = vld [vmem:[%s2287_s1 + $0xf4] ss:$8 sps:$4 sm:$0xff]   ;;  %v1583_v32 = vld [vmem:[%s2287_s1 + $0x100] ss:$8 sps:$4 sm:$0xff]  }
   0xc   :  { %753 = vmatprep.subr.bf16.mxu0 %v1554_v11  ;;  %793 = vmatpush1.bf16.msra.mxu1 %v1553_v12  ;;  %v1587_v33 = vld [vmem:[%s2287_s1 + $0x1f4] ss:$8 sps:$4 sm:$0xff]   ;;  %v1586_v34 = vld [vmem:[%s2287_s1 + $0xf0] ss:$8 sps:$4 sm:$0xff]   ;;  %v1590_v35 = vld [vmem:[%s2287_s1 + $0xe4] ss:$8 sps:$4 sm:$0xff]  }
   0xd   :  { %794 = vmatprep.subr.bf16.mxu1 %v1557_v13  ;;  %v1589_v36 = vld [vmem:[%s2287_s1 + $0x1f0] ss:$8 sps:$4 sm:$0xff]   ;;  %v1593_v37 = vld [vmem:[%s2287_s1 + $0x1e4] ss:$8 sps:$4 sm:$0xff]   ;;  %v1592_v38 = vld [vmem:[%s2287_s1 + $0xe0] ss:$8 sps:$4 sm:$0xff]  }
   0xe   :  { %v1596_v39 = vld [vmem:[%s2287_s1 + $0xd4] ss:$8 sps:$4 sm:$0xff]   ;;  %v1595_v40 = vld [vmem:[%s2287_s1 + $0x1e0] ss:$8 sps:$4 sm:$0xff]   ;;  %v1598_v42 = vld [vmem:[%s2287_s1 + $0xd0] ss:$8 sps:$4 sm:$0xff]  }
   0xf   :  { %754 = vmatpush1.bf16.msra.mxu0 %v1556_v14  ;;  %v1599_v41 = vld [vmem:[%s2287_s1 + $0x1d4] ss:$8 sps:$4 sm:$0xff]   ;;  %v1602_v43 = vld [vmem:[%s2287_s1 + $0xc4] ss:$8 sps:$4 sm:$0xff]   ;;  %v1601_v44 = vld [vmem:[%s2287_s1 + $0x1d0] ss:$8 sps:$4 sm:$0xff]  }
  0x10   :  { %755 = vmatprep.subr.bf16.mxu0 %v1560_v15  ;;  %795 = vmatpush1.bf16.msra.mxu1 %v1559_v16  ;;  %v1605_v45 = vld [vmem:[%s2287_s1 + $0x1c4] ss:$8 sps:$4 sm:$0xff]   ;;  %v1604_v47 = vld [vmem:[%s2287_s1 + $0xc0] ss:$8 sps:$4 sm:$0xff]   ;;  %v1608_v49 = vld [vmem:[%s2287_s1 + $0xb4] ss:$8 sps:$4 sm:$0xff]  }
  0x11   :  { %796 = vmatprep.subr.bf16.mxu1 %v1563_v17  ;;  %v34_v46 = vld [vmem:[%s2286_s0] sm:$0xff]  ;;  %v35_v50 = vld [vmem:[%s2286_s0 + $0x8] sm:$0xff]  ;;  %v1611_v53 = vld [vmem:[%s2287_s1 + $0x1b4] ss:$8 sps:$4 sm:$0xff]   ;;  %v1765_v15 = vmov 0  }
  0x12   :  { %v1314_v48 = vcombine.high %v34_v46, %v34_v46  ;;  %v1607_v51 = vld [vmem:[%s2287_s1 + $0x1c0] ss:$8 sps:$4 sm:$0xff]   ;;  %v1316_v52 = vcombine.high %v35_v50, %v35_v50  ;;  %v1610_v54 = vld [vmem:[%s2287_s1 + $0xb0] ss:$8 sps:$4 sm:$0xff]   ;;  %v1614_v55 = vld [vmem:[%s2287_s1 + $0xa4] ss:$8 sps:$4 sm:$0xff]   ;;  %v1313_v5 = vcombine.low %v34_v46, %v34_v46  ;;  %v1315_v8 = vcombine.low %v35_v50, %v35_v50 }
  0x13   :  { %756 = vmatpush1.bf16.msra.mxu0 %v1562_v18  ;;  %v1613_v56 = vld [vmem:[%s2287_s1 + $0x1b0] ss:$8 sps:$4 sm:$0xff]   ;;  %v1617_v57 = vld [vmem:[%s2287_s1 + $0x1a4] ss:$8 sps:$4 sm:$0xff]   ;;  %v1616_v58 = vld [vmem:[%s2287_s1 + $0xa0] ss:$8 sps:$4 sm:$0xff]  }
  0x14   :  { %757 = vmatprep.subr.bf16.mxu0 %v1566_v19  ;;  %797 = vmatpush1.bf16.msra.mxu1 %v1565_v20  ;;  %v1620_v59 = vld [vmem:[%s2287_s1 + $0x94] ss:$8 sps:$4 sm:$0xff]   ;;  %v1619_v60 = vld [vmem:[%s2287_s1 + $0x1a0] ss:$8 sps:$4 sm:$0xff]   ;;  %v1622_v62 = vld [vmem:[%s2287_s1 + $0x90] ss:$8 sps:$4 sm:$0xff]  }
  0x15   :  { %798 = vmatprep.subr.bf16.mxu1 %v1569_v21  ;;  %779 = vmatprep.mubr.bf16.mxu0 %v1314_v48  ;;  %v1623_v61 = vld [vmem:[%s2287_s1 + $0x194] ss:$8 sps:$4 sm:$0xff]   ;;  %v1626_v63 = vld [vmem:[%s2287_s1 + $0x84] ss:$8 sps:$4 sm:$0xff]   ;;  %v1625_v0 = vld [vmem:[%s2287_s1 + $0x190] ss:$8 sps:$4 sm:$0xff]  }
  0x16   :  { %820 = vmatprep.mubr.bf16.mxu1 %v1316_v52  ;;  %v1629_v1 = vld [vmem:[%s2287_s1 + $0x184] ss:$8 sps:$4 sm:$0xff]   ;;  %v1628_v2 = vld [vmem:[%s2287_s1 + $0x80] ss:$8 sps:$4 sm:$0xff]   ;;  %v1636_v3 = vld [vmem:[%s2287_s1 + $0x274] ss:$8 sps:$4 sm:$0xff]  }
  0x17   :  { %758 = vmatpush1.bf16.msra.mxu0 %v1568_v22  ;;  %v1633_v4 = vld [vmem:[%s2287_s1 + $0x180] ss:$8 sps:$4 sm:$0xff]   ;;  %v1662_v6 = vld [vmem:[%s2287_s1 + $0x374] ss:$8 sps:$4 sm:$0xff]   ;;  %v1634_v7 = vld [vmem:[%s2287_s1 + $0x270] ss:$8 sps:$4 sm:$0xff]  }
  0x18   :  { %759 = vmatprep.subr.bf16.mxu0 %v1572_v23  ;;  %799 = vmatpush1.bf16.msra.mxu1 %v1571_v24  ;;  %v1641_v9 = vld [vmem:[%s2287_s1 + $0x264] ss:$8 sps:$4 sm:$0xff]   ;;  %v1660_v10 = vld [vmem:[%s2287_s1 + $0x370] ss:$8 sps:$4 sm:$0xff]   ;;  %v1639_v12 = vld [vmem:[%s2287_s1 + $0x260] ss:$8 sps:$4 sm:$0xff]  }
  0x19   :  { %800 = vmatprep.subr.bf16.mxu1 %v1575_v25  ;;  %v1668_v11 = vld [vmem:[%s2287_s1 + $0x364] ss:$8 sps:$4 sm:$0xff]   ;;  %v1644_v13 = vld [vmem:[%s2287_s1 + $0x254] ss:$8 sps:$4 sm:$0xff]   ;;  %v1666_v14 = vld [vmem:[%s2287_s1 + $0x360] ss:$8 sps:$4 sm:$0xff]  }
  0x1a   :  { %v1674_v16 = vld [vmem:[%s2287_s1 + $0x354] ss:$8 sps:$4 sm:$0xff]   ;;  %v1642_v17 = vld [vmem:[%s2287_s1 + $0x250] ss:$8 sps:$4 sm:$0xff]   ;;  %v1647_v18 = vld [vmem:[%s2287_s1 + $0x244] ss:$8 sps:$4 sm:$0xff]  }
  0x1b   :  { %760 = vmatpush1.bf16.msra.mxu0 %v1574_v26  ;;  %v1645_v19 = vld [vmem:[%s2287_s1 + $0x240] ss:$8 sps:$4 sm:$0xff]   ;;  %v1672_v20 = vld [vmem:[%s2287_s1 + $0x350] ss:$8 sps:$4 sm:$0xff]   ;;  %v1680_v21 = vld [vmem:[%s2287_s1 + $0x344] ss:$8 sps:$4 sm:$0xff]  }
  0x1c   :  { %761 = vmatprep.subr.bf16.mxu0 %v1578_v27  ;;  %801 = vmatpush1.bf16.msra.mxu1 %v1577_v28  ;;  %v1650_v22 = vld [vmem:[%s2287_s1 + $0x234] ss:$8 sps:$4 sm:$0xff]   ;;  %v1678_v23 = vld [vmem:[%s2287_s1 + $0x340] ss:$8 sps:$4 sm:$0xff]   ;;  %v1648_v26 = vld [vmem:[%s2287_s1 + $0x230] ss:$8 sps:$4 sm:$0xff]  }
  0x1d   :  { %802 = vmatprep.subr.bf16.mxu1 %v1581_v29  ;;  %v1686_v24 = vld [vmem:[%s2287_s1 + $0x334] ss:$8 sps:$4 sm:$0xff]   ;;  %v1653_v28 = vld [vmem:[%s2287_s1 + $0x224] ss:$8 sps:$4 sm:$0xff]   ;;  %v1684_v29 = vld [vmem:[%s2287_s1 + $0x330] ss:$8 sps:$4 sm:$0xff]  }
  0x1e   :  { %v2074_v25 = vld [vmem:[%s2286_s0 + $0x10] sm:$0xff] }
  0x1f   :  { %762 = vmatpush1.bf16.msra.mxu0 %v1580_v30  ;;  %v1318_v27 = vcombine.high %v2074_v25, %v2074_v25  ;;  %v1692_v30 = vld [vmem:[%s2287_s1 + $0x324] ss:$8 sps:$4 sm:$0xff]  }
  0x20   :  { %763 = vmatprep.subr.bf16.mxu0 %v1584_v31  ;;  %803 = vmatpush1.bf16.msra.mxu1 %v1583_v32  ;;  %v1651_v31 = vld [vmem:[%s2287_s1 + $0x220] ss:$8 sps:$4 sm:$0xff]   ;;  %v1656_v32 = vld [vmem:[%s2287_s1 + $0x214] ss:$8 sps:$4 sm:$0xff]  }
  0x21   :  { %804 = vmatprep.subr.bf16.mxu1 %v1587_v33  ;;  %v1690_v33 = vld [vmem:[%s2287_s1 + $0x320] ss:$8 sps:$4 sm:$0xff]  }
  0x23   :  { %764 = vmatpush2.bf16.msra.mxu0 %v1586_v34  ;;  %v1698_v34 = vld [vmem:[%s2287_s1 + $0x314] ss:$8 sps:$4 sm:$0xff]  }
  0x24   :  { %765 = vmatprep.subr.bf16.mxu0 %v1590_v35  ;;  %805 = vmatpush2.bf16.msra.mxu1 %v1589_v36  ;;  %v1654_v35 = vld [vmem:[%s2287_s1 + $0x210] ss:$8 sps:$4 sm:$0xff]   ;;  %v1659_v36 = vld [vmem:[%s2287_s1 + $0x204] ss:$8 sps:$4 sm:$0xff]  }
  0x25   :  { %806 = vmatprep.subr.bf16.mxu1 %v1593_v37  ;;  %v1696_v37 = vld [vmem:[%s2287_s1 + $0x310] ss:$8 sps:$4 sm:$0xff]  }
  0x27   :  { %766 = vmatpush2.bf16.msra.mxu0 %v1592_v38  ;;  %v1704_v38 = vld [vmem:[%s2287_s1 + $0x304] ss:$8 sps:$4 sm:$0xff]  }
  0x28   :  { %767 = vmatprep.subr.bf16.mxu0 %v1596_v39  ;;  %807 = vmatpush2.bf16.msra.mxu1 %v1595_v40  ;;  %v1657_v39 = vld [vmem:[%s2287_s1 + $0x200] ss:$8 sps:$4 sm:$0xff]   ;;  %v1665_v40 = vld [vmem:[%s2287_s1 + $0x2f4] ss:$8 sps:$4 sm:$0xff]  }
  0x29   :  { %808 = vmatprep.subr.bf16.mxu1 %v1599_v41  ;;  %v1702_v41 = vld [vmem:[%s2287_s1 + $0x300] ss:$8 sps:$4 sm:$0xff]  }
  0x2b   :  { %768 = vmatpush2.bf16.msra.mxu0 %v1598_v42  ;;  %v1663_v42 = vld [vmem:[%s2287_s1 + $0x2f0] ss:$8 sps:$4 sm:$0xff]  }
  0x2c   :  { %769 = vmatprep.subr.bf16.mxu0 %v1602_v43  ;;  %809 = vmatpush2.bf16.msra.mxu1 %v1601_v44 }
  0x2d   :  { %810 = vmatprep.subr.bf16.mxu1 %v1605_v45 }
  0x2f   :  { %770 = vmatpush2.bf16.msra.mxu0 %v1604_v47 }
  0x30   :  { %771 = vmatprep.subr.bf16.mxu0 %v1608_v49  ;;  %811 = vmatpush2.bf16.msra.mxu1 %v1607_v51 }
  0x31   :  { %812 = vmatprep.subr.bf16.mxu1 %v1611_v53 }
  0x33   :  { %772 = vmatpush2.bf16.msra.mxu0 %v1610_v54 }
  0x34   :  { %773 = vmatprep.subr.bf16.mxu0 %v1614_v55  ;;  %813 = vmatpush2.bf16.msra.mxu1 %v1613_v56 }
  0x35   :  { %814 = vmatprep.subr.bf16.mxu1 %v1617_v57 }
  0x37   :  { %774 = vmatpush2.bf16.msra.mxu0 %v1616_v58 }
  0x38   :  { %775 = vmatprep.subr.bf16.mxu0 %v1620_v59  ;;  %815 = vmatpush2.bf16.msra.mxu1 %v1619_v60 }
  0x39   :  { %816 = vmatprep.subr.bf16.mxu1 %v1623_v61 }
  0x3b   :  { %776 = vmatpush2.bf16.msra.mxu0 %v1622_v62 }
  0x3c   :  { %777 = vmatprep.subr.bf16.mxu0 %v1626_v63  ;;  %817 = vmatpush2.bf16.msra.mxu1 %v1625_v0 }
  0x3d   :  { %818 = vmatprep.subr.bf16.mxu1 %v1629_v1 }
  0x3f   :  { %778 = vmatpush2.bf16.msra.mxu0 %v1628_v2 }
  0x40   :  { %829 = vmatprep.subr.bf16.mxu0 %v1636_v3  ;;  %819 = vmatpush2.bf16.msra.mxu1 %v1633_v4 }
  0x41   :  { %870 = vmatprep.subr.bf16.mxu1 %v1662_v6 }
  0x42   :  { %780 = vmatmul.mubr.bf16.vlgmr.msra.gmra.mxu0 %v1313_v5 }
  0x43   :  { %830 = vmatpush1.bf16.msra.mxu0 %v1634_v7  ;;  %821 = vmatmul.mubr.bf16.vlgmr.msra.gmra.mxu1 %v1315_v8 }
  0x44   :  { %831 = vmatprep.subr.bf16.mxu0 %v1641_v9  ;;  %871 = vmatpush1.bf16.msra.mxu1 %v1660_v10 }
  0x45   :  { %902 = vmatprep.mubr.bf16.mxu1 %v1765_v15  ;;  %872 = vmatprep.subr.bf16.mxu1 %v1668_v11 }
  0x46   :  { %861 = vmatprep.mubr.bf16.mxu0 %v1318_v27 }
  0x47   :  { %832 = vmatpush1.bf16.msra.mxu0 %v1639_v12 }
  0x48   :  { %833 = vmatprep.subr.bf16.mxu0 %v1644_v13  ;;  %873 = vmatpush1.bf16.msra.mxu1 %v1666_v14 }
  0x49   :  { %874 = vmatprep.subr.bf16.mxu1 %v1674_v16 }
  0x4b   :  { %834 = vmatpush1.bf16.msra.mxu0 %v1642_v17 }
  0x4c   :  { %835 = vmatprep.subr.bf16.mxu0 %v1647_v18  ;;  %875 = vmatpush1.bf16.msra.mxu1 %v1672_v20 }
  0x4d   :  { %876 = vmatprep.subr.bf16.mxu1 %v1680_v21 }
  0x4f   :  { %836 = vmatpush1.bf16.msra.mxu0 %v1645_v19 }
  0x50   :  { %837 = vmatprep.subr.bf16.mxu0 %v1650_v22  ;;  %877 = vmatpush1.bf16.msra.mxu1 %v1678_v23 }
  0x51   :  { %878 = vmatprep.subr.bf16.mxu1 %v1686_v24 }
  0x53   :  { %838 = vmatpush1.bf16.msra.mxu0 %v1648_v26 }
  0x54   :  { %839 = vmatprep.subr.bf16.mxu0 %v1653_v28  ;;  %879 = vmatpush1.bf16.msra.mxu1 %v1684_v29 }
  0x55   :  { %880 = vmatprep.subr.bf16.mxu1 %v1692_v30 }
  0x57   :  { %840 = vmatpush1.bf16.msra.mxu0 %v1651_v31 }
  0x58   :  { %841 = vmatprep.subr.bf16.mxu0 %v1656_v32  ;;  %881 = vmatpush1.bf16.msra.mxu1 %v1690_v33 }
  0x59   :  { %882 = vmatprep.subr.bf16.mxu1 %v1698_v34 }
  0x5b   :  { %842 = vmatpush1.bf16.msra.mxu0 %v1654_v35 }
  0x5c   :  { %843 = vmatprep.subr.bf16.mxu0 %v1659_v36  ;;  %883 = vmatpush1.bf16.msra.mxu1 %v1696_v37 }
  0x5d   :  { %884 = vmatprep.subr.bf16.mxu1 %v1704_v38 }
  0x5f   :  { %844 = vmatpush1.bf16.msra.mxu0 %v1657_v39 }
  0x60   :  { %14 = vsyncpa [#allocation3], 0  ;;  %845 = vmatprep.subr.bf16.mxu0 %v1665_v40  ;;  %v1671_v43 = vld [vmem:[%s2287_s1 + $0x2e4] ss:$8 sps:$4 sm:$0xff]   ;;  %v1708_v44 = vld [vmem:[%s2286_s0 + $0x18] ss:$0 sps:$4 sm:$0xff]   ;;  %885 = vmatpush1.bf16.msra.mxu1 %v1702_v41  ;;  %v1317_v58 = vcombine.low %v2074_v25, %v2074_v25  ;;  %v152_v29 = vlaneseq }
  0x61   :  { %v1669_v45 = vld [vmem:[%s2287_s1 + $0x2e0] ss:$8 sps:$4 sm:$0xff]   ;;  %v1677_v46 = vld [vmem:[%s2287_s1 + $0x2d4] ss:$8 sps:$4 sm:$0xff]   ;;  %v1675_v47 = vld [vmem:[%s2287_s1 + $0x2d0] ss:$8 sps:$4 sm:$0xff]  }
  0x62   :  { %v1683_v48 = vld [vmem:[%s2287_s1 + $0x2c4] ss:$8 sps:$4 sm:$0xff]   ;;  %v1681_v49 = vld [vmem:[%s2287_s1 + $0x2c0] ss:$8 sps:$4 sm:$0xff]   ;;  %v1689_v50 = vld [vmem:[%s2287_s1 + $0x2b4] ss:$8 sps:$4 sm:$0xff]  }
  0x63   :  { %846 = vmatpush2.bf16.msra.mxu0 %v1663_v42  ;;  %903 = vmatmul.mubr.bf16.vlgmr.msra.gmra.mxu1 %v1708_v44  ;;  %v1687_v51 = vld [vmem:[%s2287_s1 + $0x2b0] ss:$8 sps:$4 sm:$0xff]   ;;  %v1695_v52 = vld [vmem:[%s2287_s1 + $0x2a4] ss:$8 sps:$4 sm:$0xff]   ;;  %v1693_v53 = vld [vmem:[%s2287_s1 + $0x2a0] ss:$8 sps:$4 sm:$0xff]  }
  0x64   :  { %847 = vmatprep.subr.bf16.mxu0 %v1671_v43  ;;  %v1701_v54 = vld [vmem:[%s2287_s1 + $0x294] ss:$8 sps:$4 sm:$0xff]   ;;  %v1699_v55 = vld [vmem:[%s2287_s1 + $0x290] ss:$8 sps:$4 sm:$0xff]   ;;  %v1707_v56 = vld [vmem:[%s2287_s1 + $0x284] ss:$8 sps:$4 sm:$0xff]  }
  0x65   :  { %v1705_v57 = vld [vmem:[%s2287_s1 + $0x280] ss:$8 sps:$4 sm:$0xff]   ;;  %v1711_v59 = vld [vmem:[%s2289_s3 + $0x78] sm:$0xff]   ;;  %v1713_v61 = vld [vmem:[%s2289_s3 + $0x70] sm:$0xff]   ;;  %v1766_v12 = vmov 0.0   ;;  %v153_v30 = vshrl.u32 %v152_v29, 7 }
  0x66   :  { %v1712_v60 = vld [vmem:[%s2289_s3 + $0x38] sm:$0xff]   ;;  %1464 = vmatprep.subr.bf16.mxu1 %v1711_v59  ;;  %v1714_v62 = vld [vmem:[%s2289_s3 + $0x30] sm:$0xff]   ;;  %v1715_v63 = vld [vmem:[%s2289_s3 + $0x68] sm:$0xff]   ;;  %vm1767_vm0 = vmmov 0   ;;  %vm1244_vm1 = vcmask 523264  }
  0x67   :  { %848 = vmatpush2.bf16.msra.mxu0 %v1669_v45  ;;  %1465 = vmatpush3.bf16.msra.mxu1 %v1712_v60  ;;  %v1716_v0 = vld [vmem:[%s2289_s3 + $0x28] sm:$0xff]   ;;  %v1717_v1 = vld [vmem:[%s2289_s3 + $0x60] sm:$0xff]   ;;  %v1719_v3 = vld [vmem:[%s2289_s3 + $0x58] sm:$0xff]   ;;  %v154_v31 = vsub.s32 0, %v153_v30  ;;  %v158_v33 = vsub.s32 1, %v153_v30 }
  0x68   :  { %849 = vmatprep.subr.bf16.mxu0 %v1677_v46  ;;  %1466 = vmatprep.subr.bf16.mxu1 %v1713_v61  ;;  %v1718_v2 = vld [vmem:[%s2289_s3 + $0x20] sm:$0xff]   ;;  %v1720_v4 = vld [vmem:[%s2289_s3 + $0x18] sm:$0xff]   ;;  %v1721_v5 = vld [vmem:[%s2289_s3 + $0x50] sm:$0xff]  }
  0x69   :  { %v1722_v6 = vld [vmem:[%s2289_s3 + $0x10] sm:$0xff]   ;;  %v1723_v7 = vld [vmem:[%s2289_s3 + $0x48] sm:$0xff]   ;;  %v1725_v9 = vld [vmem:[%s2289_s3 + $0x40] sm:$0xff]  }
  0x6a   :  { %v1724_v8 = vld [vmem:[%s2289_s3 + $0x8] sm:$0xff]   ;;  %v1726_v10 = vld [vmem:[%s2289_s3] sm:$0xff]   ;;  %v1727_v11 = vld [vmem:[%s2291_s5 + $0x38] sm:$0xff]  }
  0x6b   :  { %850 = vmatpush2.bf16.msra.mxu0 %v1675_v47  ;;  %1467 = vmatpush3.bf16.msra.mxu1 %v1714_v62  ;;  %v1728_v13 = vld [vmem:[%s2291_s5 + $0x30] sm:$0xff]   ;;  %v1729_v14 = vld [vmem:[%s2291_s5 + $0x28] sm:$0xff]   ;;  %v1730_v15 = vld [vmem:[%s2291_s5 + $0x20] sm:$0xff]  }
  0x6c   :  { %851 = vmatprep.subr.bf16.mxu0 %v1683_v48  ;;  %1468 = vmatprep.subr.bf16.mxu1 %v1715_v63  ;;  %v1731_v16 = vld [vmem:[%s2291_s5 + $0x18] sm:$0xff]   ;;  %v150_v32 = vld [vmem:[%s2288_s2] sm:$0x3] }
  0x6d   :  { %v155_v34 = vrot.slane %v150_v32, %v154_v31  ;;  %v159_v35 = vrot.slane %v150_v32, %v158_v33 }
  0x6f   :  { %852 = vmatpush2.bf16.msra.mxu0 %v1681_v49  ;;  %1469 = vmatpush3.bf16.msra.mxu1 %v1716_v0 }
  0x70   :  { %853 = vmatprep.subr.bf16.mxu0 %v1689_v50  ;;  %1470 = vmatprep.subr.bf16.mxu1 %v1717_v1 }
  0x73   :  { %854 = vmatpush2.bf16.msra.mxu0 %v1687_v51  ;;  %1471 = vmatpush3.bf16.msra.mxu1 %v1718_v2  ;;  %v1737_v2 = vld [vmem:[%s2293_s7 + $0x8] sm:$0xff]  }
  0x74   :  { %855 = vmatprep.subr.bf16.mxu0 %v1695_v52  ;;  %1472 = vmatprep.subr.bf16.mxu1 %v1719_v3  ;;  %v1732_v52 = vld [vmem:[%s2291_s5 + $0x10] sm:$0xff]   ;;  %v1738_v3 = vld [vmem:[%s2293_s7] sm:$0xff]  }
  0x77   :  { %856 = vmatpush2.bf16.msra.mxu0 %v1693_v53  ;;  %1473 = vmatpush3.bf16.msra.mxu1 %v1720_v4  ;;  %v1733_v53 = vld [vmem:[%s2291_s5 + $0x8] sm:$0xff]   ;;  %v1449_v4 = vld [vmem:[%s2292_s6] ss:$0 sm:$0xff]  ;;  %s1768_s6 = smov [#allocation2]  }
  0x78   :  { %857 = vmatprep.subr.bf16.mxu0 %v1701_v54  ;;  %1474 = vmatprep.subr.bf16.mxu1 %v1721_v5  ;;  %v1734_v54 = vld [vmem:[%s2291_s5] sm:$0xff]  }
  0x7b   :  { %858 = vmatpush2.bf16.msra.mxu0 %v1699_v55  ;;  %1475 = vmatpush3.bf16.msra.mxu1 %v1722_v6  ;;  %v1735_v55 = vld [vmem:[%s2293_s7 + $0x18] sm:$0xff]  }
  0x7c   :  { %859 = vmatprep.subr.bf16.mxu0 %v1707_v56  ;;  %1476 = vmatprep.subr.bf16.mxu1 %v1723_v7  ;;  %v1736_v56 = vld [vmem:[%s2293_s7 + $0x10] sm:$0xff]   ;;  %s1305_s7 = sshll.u32 %s1768_s6, 4  ;;  %s1306_s7 = int_to_ptr.vmem [resolvable:$true] %s1305_s7 }
  0x7d   :  { %p1748_p1 = scmp.lt.s32.totalorder %s1306_s7, %s1306_s7 }
  0x7f   :  { %860 = vmatpush2.bf16.msra.mxu0 %v1705_v57  ;;  %1477 = vmatpush3.bf16.msra.mxu1 %v1724_v8 }
  0x80   :  { %1478 = vmatprep.subr.bf16.mxu1 %v1725_v9  ;;  %1500 = vmatprep.subr.bf16.mxu0 %v1766_v12 }
  0x82   :  { %862 = vmatmul.mubr.bf16.vlgmr.msra.gmra.mxu0 %v1317_v58  ;;  %v1432_v58 = vld [vmem:[%s2290_s4] ss:$0 sm:$0xff] }
  0x83   :  { %1479 = vmatpush3.bf16.msra.mxu1 %v1726_v10  ;;  %1501 = vmatpush3.bf16.msra.mxu0 %v1727_v11 }
  0x84   :  { %1520 = vmatprep.subr.bf16.mxu1 %v1766_v12  ;;  %1502 = vmatprep.subr.bf16.mxu0 %v1766_v12 }
  0x85   :  { %1516 = vmatprep.mubr.msk.bf16.mxu0 %vm1767_vm0, %v1766_v12 }
  0x87   :  { %1503 = vmatpush3.bf16.msra.mxu0 %v1728_v13 }
  0x88   :  { %1504 = vmatprep.subr.bf16.mxu0 %v1766_v12 }
  0x8b   :  { %1505 = vmatpush3.bf16.msra.mxu0 %v1729_v14 }
  0x8c   :  { %1506 = vmatprep.subr.bf16.mxu0 %v1766_v12 }
  0x8f   :  { %1507 = vmatpush3.bf16.msra.mxu0 %v1730_v15 }
  0x90   :  { %1508 = vmatprep.subr.bf16.mxu0 %v1766_v12 }
  0x93   :  { %1509 = vmatpush3.bf16.msra.mxu0 %v1731_v16 }
  0x94   :  { %1510 = vmatprep.subr.bf16.mxu0 %v1766_v12 }
  0x97   :  { %1511 = vmatpush3.bf16.msra.mxu0 %v1732_v52 }
  0x98   :  { %1512 = vmatprep.subr.bf16.mxu0 %v1766_v12 }
  0x9b   :  { %1513 = vmatpush3.bf16.msra.mxu0 %v1733_v53 }
  0x9c   :  { %1514 = vmatprep.subr.bf16.mxu0 %v1766_v12 }
  0x9f   :  { %1515 = vmatpush3.bf16.msra.mxu0 %v1734_v54 }
 0x102   :  { %v781_v17 = vpop.f32.mrf.mxu0 }
 0x103   :  { %v822_v19 = vpop.f32.mrf.mxu1  ;;  %v782_v36 = vadd.f32 %v781_v17, %v155_v34 }
 0x104   :  { %v783_v18 = vpop.f32.mrf.mxu0 }
 0x105   :  { %v824_v21 = vpop.f32.mrf.mxu1  ;;  %v784_v37 = vadd.f32 %v783_v18, %v159_v35  ;;  %v823_v38 = vadd.f32 %v822_v19, %v782_v36 }
 0x106   :  { %v785_v20 = vpop.f32.mrf.mxu0 }
 0x107   :  { %v826_v23 = vpop.f32.mrf.mxu1  ;;  %v825_v40 = vadd.f32 %v824_v21, %v784_v37 }
 0x108   :  { %v786_v22 = vpop.f32.mrf.mxu0 }
 0x109   :  { %v827_v24 = vpop.f32.mrf.mxu1 }
 0x123   :  { %v904_v25 = vpop.f32.mrf.mxu1 }
 0x125   :  { %v906_v26 = vpop.f32.mrf.mxu1 }
 0x127   :  { %v908_v27 = vpop.f32.mrf.mxu1 }
 0x129   :  { %v909_v28 = vpop.f32.mrf.mxu1 }
 0x142   :  { %v863_v39 = vpop.f32.mrf.mxu0 }
 0x143   :  { %v864_v41 = vadd.f32 %v863_v39, %v823_v38 }
 0x144   :  { %v865_v42 = vpop.f32.mrf.mxu0 }
 0x145   :  { %v905_v43 = vadd.f32 %v904_v25, %v864_v41  ;;  %v866_v44 = vadd.f32 %v865_v42, %v825_v40 }
 0x146   :  { %v867_v45 = vpop.f32.mrf.mxu0 }
 0x147   :  { %v907_v46 = vadd.f32 %v906_v26, %v866_v44  ;;  %v911_v47 = vmax.f32 %v905_v43, 0.0 }
 0x148   :  { %v868_v48 = vpop.f32.mrf.mxu0 }
 0x149   :  { %v912_v49 = vmax.f32 %v907_v46, 0.0  ;;  %v913_v51 = vpack.c.bf16 %v911_v47, %v911_v47 }
 0x14b   :  { %v914_v50 = vpack.c.bf16 %v912_v49, %v912_v49 }
 0x14d   :  { %1082 = vmatprep.mubr.bf16.mxu1 %v914_v50 }
 0x14e   :  { %1083 = vmatmul.mubr.bf16.vlgmr.msra.gmra.mxu1 %v913_v51 }
 0x14f   :  { %1528 = vmatprep.mubr.msk.bf16.mxu1 %vm1767_vm0, %v1766_v12  ;;  %1521 = vmatpush3.bf16.msra.mxu1 %v1735_v55 }
 0x150   :  { %1522 = vmatprep.subr.bf16.mxu1 %v1766_v12 }
 0x153   :  { %1523 = vmatpush3.bf16.msra.mxu1 %v1736_v56 }
 0x154   :  { %1524 = vmatprep.subr.bf16.mxu1 %v1766_v12 }
 0x157   :  { %1525 = vmatpush3.bf16.msra.mxu1 %v1737_v2 }
 0x158   :  { %1526 = vmatprep.subr.bf16.mxu1 %v1766_v12  ;;  %v1458_v12 = vld [vmem:[%s2294_s8] ss:$0 sm:$0xff]  ;;  %s1743_s8 = scalar_lea.vmem %s1306_s7, 128 }
 0x159   :  { %p1744_p0 = scmp.ne.s32.totalorder %s1306_s7, %s1743_s8  ;;  %p1749_p2 = scmp.lt.s32.totalorder %s1743_s8, %s1743_s8 }
 0x15b   :  { %1527 = vmatpush3.bf16.msra.mxu1 %v1738_v3  ;;  %p1750_p3 = por %p1749_p2, %p1748_p1 }
 0x15d   :  { %p1751_p4 = pnand %p1750_p3, %p1744_p0 }
 0x20e   :  { %v1480_v57 = vpop.f32.mrf.mxu1 }
 0x210   :  { %v1481_v59 = vpop.f32.mrf.mxu1 }
 0x211   :  { %v1482_v60 = vadd.f32 %v1481_v59, %v1480_v57 }
 0x212   :  { %v1483_v61 = vpop.f32.mrf.mxu1 }
 0x213   :  { %v1085_v62 = vadd.f32 %v1482_v60, %v1432_v58 }
 0x214   :  { %v1484_v63 = vpop.f32.mrf.mxu1 }
 0x215   :  { %v1090_v0 = vmax.f32 %v1085_v62, 0.0 }
 0x217   :  { %v1091_v1 = vpack.c.bf16 %v1090_v0, %v1090_v0 }
 0x219   :  { %1517 = vmatmul.mubr.bf16.vlgmr.msra.gmra.mxu0 %v1091_v1 }
 0x2d9   :  { %v1197_v5 = vpop.f32.mrf.mxu0 }
 0x2da   :  { %v1198_v6 = vadd.f32 %v1449_v4, %v1197_v5 }
 0x2db   :  { %v1518_v7 = vpop.f32.mrf.mxu0 }
 0x2dc   :  { %v1203_v8 = vmax.f32 %v1198_v6, 0.0 }
 0x2dd   :  { %v1200_v9 = vpop.f32.mrf.mxu0 }
 0x2de   :  { %v1204_v10 = vpack.c.bf16 %v1203_v8, %v1203_v8 }
 0x2df   :  { %v1519_v11 = vpop.f32.mrf.mxu0 }
 0x2e0   :  { %1529 = vmatmul.mubr.msk.bf16.vlgmr.msra.gmra.mxu1 %vm1244_vm1, %v1204_v10 }
 0x3a0   :  { %v1282_v13 = vpop.f32.mrf.mxu1 }
 0x3a1   :  { %v1283_v14 = vadd.f32 %v1458_v12, %v1282_v13 }
 0x3a2   :  { %v1530_v15 = vpop.f32.mrf.mxu1 }
 0x3a3   :  { %1288 = vmax.xlane.f32.xlu0 %v1283_v14 }
 0x3a4   :  { %v1285_v16 = vpop.f32.mrf.mxu1 }
 0x3a6   :  { %v1531_v17 = vpop.f32.mrf.mxu1 }
 0x42c   :  { %v1289_v18 = vpop.xlane.xlu0 %1288 }
 0x42d   :  { %v1290_v19 = vsub.f32 %v1283_v14, %v1289_v18 }
 0x42f   :  { %v1291_v20 = vmul.f32 1.442695, %v1290_v19 }
 0x431   :  { %1739 = vpow2.f32 %v1291_v20 }
 0x43e   :  { %v1740_v21 = vpop.eup %1739 }
 0x43f   :  { %1293 = vadd.xlane.f32.xlu0 %v1740_v21 }
 0x4c8   :  { %v1294_v22 = vpop.xlane.xlu0 %1293 }
 0x4c9   :  { %1741 = vlog2.f32 %v1294_v22 }
 0x4d6   :  { %v1742_v23 = vpop.eup %1741 }
 0x4d7   :  { %v1296_v24 = vmul.f32 0.6931472, %v1742_v23 }
 0x4d9   :  { %v1297_v25 = vsub.f32 %v1290_v19, %v1296_v24 }
 0x4db   :  { %1298 = vst [vmem:[#allocation2] sm:$0xff] %v1297_v25 }
 0x4dc   :  { %1754 = shalt.err (!%p1751_p4)
}
 0x4dd   :  { %1308 = dma.vmem_to_hbm [thread:$0]  %s1306_s7, 128, %s2295_s9, [#allocation3]  }
 0x4de   :  { %1763 = dma.done.wait [#allocation3], 128  }
 0x4df   :  { %1764 = vsyncadd [#allocation3], 4294967168 }
 0x4e0   :  { %1312 = vsyncpa [#allocation3], 1 }

</bundles_post_ra>
